<compile_context>
chip_gen: v7x
topology: tpu7x:2x2x1
jax: 0.10.0
libtpu: 0.0.40
codegen_flags: <defaults>
</compile_context>

<pallas_src>
import functools

import jax
import jax.numpy as jnp
from jax.experimental import pallas as pl
from jax.experimental.pallas import tpu as pltpu


def fused_affine_kernel(x_ref, w_ref, b_ref, o_ref):
    # Single MXU push; bias (1, N) broadcasts over the batch tile.
    o_ref[...] = (
        jnp.dot(x_ref[...], w_ref[...], preferred_element_type=jnp.float32)
        + b_ref[...]
    ).astype(o_ref.dtype)


def _round_up(a, m):
    return ((a + m - 1) // m) * m


def mlp_forward(x, w1, b1, w2, b2, w3, b3, *, tb_max=4096, use_pallas=None):
    """Forward of Linear(8->16) -> Linear(16->32) -> Linear(32->16)."""
    B, K = x.shape

    # --- Algebraic fusion of the three affine layers (tiny, done once in XLA).
    # NOTE: with static weights under jit this constant-folds / hoists; rounding
    # differs infinitesimally from the layer-by-layer reference (covered by 1e-4).
    w = w1 @ w2 @ w3                        # (K, N) = (8, 16)
    b = (b1 @ w2 @ w3 + b2 @ w3 + b3).reshape(1, -1)   # (1, N)
    N = w.shape[1]

    if use_pallas is None:
        # At tiny batch the pallas_call fixed cost dwarfs the 2*B*K*N FLOPs.
        use_pallas = B >= 1024
    if not use_pallas:
        return x @ w + b

    # --- Batch tile selection ------------------------------------------------
    # Keep >=2 grid steps when B allows (v7x: 2 TensorCores share the
    # "parallel" axis); never exceed the (8-rounded) batch; stay a multiple of 8
    # so the block satisfies the (8, 128) sublane rule.
    # VMEM (lane-padded, double-buffered): ~2 * 2 * tb * 128 * 4 B  -> 8 MiB at
    # tb = 4096, well under the default scoped limit on v5e/v6e/v7x.
    tb = min(tb_max, _round_up(pl.cdiv(B, 2), 256))
    tb = max(tb, 8)
    tb = min(tb, _round_up(B, 8))

    grid = (pl.cdiv(B, tb),)   # ragged last block handled by Pallas (masked)

    out = pl.pallas_call(
        fused_affine_kernel,
        out_shape=jax.ShapeDtypeStruct((B, N), x.dtype),
        grid_spec=pltpu.PrefetchScalarGridSpec(
            num_scalar_prefetch=0,
            grid=grid,
            in_specs=[
                pl.BlockSpec((tb, K), lambda i: (i, 0)),   # x tile, pipelined
                pl.BlockSpec((K, N), lambda i: (0, 0)),    # fused W, resident
                pl.BlockSpec((1, N), lambda i: (0, 0)),    # fused b, resident
            ],
            out_specs=pl.BlockSpec((tb, N), lambda i: (i, 0)),
        ),
        compiler_params=pltpu.CompilerParams(
            dimension_semantics=("parallel",),
        ),
        cost_estimate=pl.CostEstimate(
            flops=2 * B * K * N,
            transcendentals=0,
            bytes_accessed=4 * (B * K + K * N + N + B * N),
        ),
    )(x, w, b)

    return out


def init_linear(key, fan_in, fan_out):
    # Deterministic PyTorch-style uniform(-1/sqrt(fan_in), 1/sqrt(fan_in)) init.
    kw, kb = jax.random.split(key)
    bound = 1.0 / jnp.sqrt(fan_in)
    w = jax.random.uniform(kw, (fan_in, fan_out), jnp.float32, -bound, bound)
    b = jax.random.uniform(kb, (1, fan_out), jnp.float32, -bound, bound)
    return w, b


if __name__ == "__main__":
    key = jax.random.PRNGKey(0)
    kx, kxl, k1, k2, k3 = jax.random.split(key, 5)

    n_feats = 8
    w1, b1 = init_linear(k1, 8, 16)
    w2, b2 = init_linear(k2, 16, 32)
    w3, b3 = init_linear(k3, 32, 16)

    def reference(xx):
        return ((xx @ w1 + b1) @ w2 + b2) @ w3 + b3

    fwd = functools.partial(jax.jit, static_argnames=("tb_max", "use_pallas"))(
        mlp_forward
    )

    # 1) Module's literal shape (1, 8): force the Pallas path to exercise the
    #    kernel (ragged single block, masked writes for rows 1..7).
    x1 = jax.random.normal(kx, (1, n_feats), jnp.float32)
    out1 = jax.block_until_ready(fwd(x1, w1, b1, w2, b2, w3, b3, use_pallas=True))
    assert out1.shape == (1, 16)
    assert jnp.allclose(out1, reference(x1), atol=1e-4, rtol=1e-4)

    # 2) Small non-divisible batch: 2 grid steps (v7x megacore path) + ragged
    #    last block, still tiny enough for a quick test.
    xb = jax.random.normal(kxl, (1000, n_feats), jnp.float32)
    outb = jax.block_until_ready(fwd(xb, w1, b1, w2, b2, w3, b3, use_pallas=True))
    assert outb.shape == (1000, 16)
    assert jnp.allclose(outb, reference(xb), atol=1e-4, rtol=1e-4)

    # 3) Default dispatch for the tiny batch: fused XLA dot, no kernel launch.
    out_fast = jax.block_until_ready(fwd(x1, w1, b1, w2, b2, w3, b3))
    assert jnp.allclose(out_fast, reference(x1), atol=1e-4, rtol=1e-4)

    print("KERNEL_OK")
</pallas_src>

<mosaic_0001>
module attributes {stable_mosaic.version = 11 : i64} {
  func.func @fused_affine_kernel(%arg0: i32, %arg1: memref<8x8xf32, #tpu.memory_space<vmem>>, %arg2: memref<8x16xf32, #tpu.memory_space<vmem>>, %arg3: memref<1x16xf32, #tpu.memory_space<vmem>>, %arg4: memref<8x16xf32, #tpu.memory_space<vmem>>) attributes {dimension_semantics = [#tpu.dimension_semantics<parallel>], iteration_bounds = array<i64: 1>, scalar_prefetch = 0 : i64, scratch_operands = 0 : i64, tpu.core_type = #tpu.core_type<tc>, window_params = [{transform_indices = @transform_0, window_bounds = array<i64: 8, 8>}, {pipeline_mode = #tpu.pipeline_mode<synchronous>, transform_indices = @transform_1, window_bounds = array<i64: 8, 16>}, {pipeline_mode = #tpu.pipeline_mode<synchronous>, transform_indices = @transform_2, window_bounds = array<i64: 1, 16>}, {transform_indices = @transform_3, window_bounds = array<i64: 8, 16>}]} {
    %c0 = arith.constant 0 : index
    %c0_0 = arith.constant 0 : index
    %0 = vector.load %arg1[%c0, %c0_0] : memref<8x8xf32, #tpu.memory_space<vmem>>, vector<8x8xf32>
    %c0_1 = arith.constant 0 : index
    %c0_2 = arith.constant 0 : index
    %1 = vector.load %arg2[%c0_1, %c0_2] : memref<8x16xf32, #tpu.memory_space<vmem>>, vector<8x16xf32>
    %cst = arith.constant dense<0.000000e+00> : vector<8x16xf32>
    %2 = tpu.matmul %0, %1, %cst {dimension_numbers = #tpu.dot_dimension_numbers<[1], [0], [0], [1], [0, 0, 1, 1], [], []>} : vector<8x8xf32>, vector<8x16xf32>, vector<8x16xf32> -> vector<8x16xf32>
    %c0_3 = arith.constant 0 : index
    %c0_4 = arith.constant 0 : index
    %3 = vector.load %arg3[%c0_3, %c0_4] : memref<1x16xf32, #tpu.memory_space<vmem>>, vector<1x16xf32>
    %4 = vector.broadcast %3 : vector<1x16xf32> to vector<8x16xf32>
    %5 = arith.addf %2, %4 : vector<8x16xf32>
    %c0_5 = arith.constant 0 : index
    %c0_6 = arith.constant 0 : index
    %6 = vector.load %arg4[%c0_5, %c0_6] : memref<8x16xf32, #tpu.memory_space<vmem>>, vector<8x16xf32>
    tpu.vector_store %arg4[%c0_5, %c0_6], %5 {strides = array<i32>} : memref<8x16xf32, #tpu.memory_space<vmem>>, vector<8x16xf32>,
    return
  }
  func.func @transform_0(%arg0: i32) -> (i32, i32) {
    %c0_i32 = arith.constant 0 : i32
    %c0_i32_0 = arith.constant 0 : i32
    return %arg0, %c0_i32 : i32, i32
  }
  func.func @transform_1(%arg0: i32) -> (i32, i32) {
    %c0_i32 = arith.constant 0 : i32
    %c0_i32_0 = arith.constant 0 : i32
    %c0_i32_1 = arith.constant 0 : i32
    return %c0_i32, %c0_i32_0 : i32, i32
  }
  func.func @transform_2(%arg0: i32) -> (i32, i32) {
    %c0_i32 = arith.constant 0 : i32
    %c0_i32_0 = arith.constant 0 : i32
    %c0_i32_1 = arith.constant 0 : i32
    return %c0_i32, %c0_i32_0 : i32, i32
  }
  func.func @transform_3(%arg0: i32) -> (i32, i32) {
    %c0_i32 = arith.constant 0 : i32
    %c0_i32_0 = arith.constant 0 : i32
    return %arg0, %c0_i32 : i32, i32
  }
}

</mosaic_0001>

<bundles_post_ra>
// kernel: mlp_forward.1
= control target key start
LH: loop header
LB: loop body
LE: loop exit
PB: predicated region body
PF: predicated region fallthrough
CT: control target
= control target key end

     0   :  { %8 = vsyncpa [#allocation3], 0  ;;  %v154_v2 = vmov 0.0   ;;  %vm155_vm0 = vmmov 0   ;;  %vm24_vm1 = vcmask 64512   ;;  %vm98_vm2 = vcmask 130048   ;;  %s200_s0 = inlined_call_operand.vmem [shape: f32[1,8], index: 0, kind: input, shape index: {}]   ;;  %s201_s1 = inlined_call_operand.vmem [shape: f32[8,16], index: 1, kind: input, shape index: {}]   ;;  %s202_s2 = inlined_call_operand.vmem [shape: f32[1,16], index: 2, kind: input, shape index: {}]   ;;  %s203_s3 = inlined_call_operand.hbm [shape: f32[1,16], index: 3, kind: output, shape index: {}]  }
   0x1   :  { %v16_v0 = vld [vmem:[%s201_s1] sm:$0xff]  ;;  %120 = vmatprep.subr.mxu0 %v154_v2  ;;  %122 = vmatprep.mubr.msk.f32.mxu0 %vm155_vm0, %v154_v2 }
   0x2   :  { %v15_v1 = vld [vmem:[%s200_s0] sm:$0xff]  ;;  %121 = vmatpush3.msra.mxu0 %v16_v0 }
   0x3   :  { %123 = vmatmul.mubr.msk.f32.vlgmr.msra.gmra.mrb[0].mxu0 %vm24_vm1, %v15_v1  ;;  %v116_v3 = vld [vmem:[%s202_s2] ss:$0 sm:$0xff] }
  0xd6   :  { %v94_v4 = vpop.f32.mrb[0].mxu0 }
  0xd7   :  { %v95_v5 = vadd.f32 %v116_v3, %v94_v4  ;;  %v124_v6 = vpop.f32.mrb[1].mxu0 }
  0xd9   :  { %99 = vst.msk [vmem:[#allocation2] sm:$0xff] %vm98_vm2, %v95_v5 }
  0xda   :  { %104 = vsyncadd [#allocation3], 112  ;;  %s156_s1 = smov [#allocation2]  }
  0xdb   :  { %s105_s18 = sshll.u32 %s156_s1, 4  ;;  %s106_s18 = int_to_ptr.vmem [resolvable:$true] %s105_s18 }
  0xdc   :  { %s130_s0 = scalar_lea.vmem %s106_s18, 16  ;;  %s134_s19 = scalar_lea.vmem %s106_s18, 128 }
  0xdd   :  { %p131_p0 = scmp.ne.s32.totalorder %s106_s18, %s130_s0  ;;  %p135_p1 = scmp.lt.s32.totalorder %s106_s18, %s106_s18 }
  0xde   :  { %p136_p2 = scmp.lt.s32.totalorder %s134_s19, %s130_s0 }
  0xe0   :  { %p137_p3 = por %p136_p2, %p135_p1 }
  0xe2   :  { %p138_p4 = pnand %p137_p3, %p131_p0 }
  0xe4   :  { %141 = shalt.err (!%p138_p4)
}
  0xe5   :  { %s142_s2 = scalar_lea.hbm %s203_s3, 16 }
  0xe6   :  { %p143_p5 = scmp.ne.s32.totalorder %s203_s3, %s142_s2  ;;  %p146_p6 = scmp.lt.u32.totalorder %s142_s2, %s203_s3 }
  0xe8   :  { %p148_p7 = pnand %p146_p6, %p143_p5 }
  0xea   :  { %151 = shalt.err (!%p148_p7)
}
  0xeb   :  { %s157_s26 = smov 16   ;;  %s158_s27 = smov 1  }
  0xec   :  { %111 = dma.vmem_to_hbm [thread:$0]  %s106_s18, 16, %s203_s3, [#allocation3], %s157_s26, %s157_s26, %s158_s27  }
  0xed   :  { %152 = dma.done.wait [#allocation3], 128  }
  0xee   :  { %153 = vsyncadd [#allocation3], 4294967168 }
  0xef   :  { %115 = vsyncpa [#allocation3], 1 }

</bundles_post_ra>
